<compile_context>
chip_gen: v7x
topology: tpu7x:2x2x1
jax: 0.10.0
libtpu: 0.0.40
codegen_flags: <defaults>
</compile_context>

<pallas_src>
import jax
import jax.numpy as jnp
from jax.experimental import pallas as pl
from jax.experimental.pallas import tpu as pltpu

EPS = 1e-5
NEG_SLOPE = 0.2


def _leaky_relu(x):
    return jnp.where(x >= 0, x, NEG_SLOPE * x)


def _bn_scale_shift(h_f32, gamma, beta):
    # Train-mode BatchNorm over the row (B*L) axis, one-pass biased variance,
    # all in f32.  Returns per-channel scale/shift so normalization is one FMA.
    mean = jnp.mean(h_f32, axis=0, keepdims=True)
    var = jnp.mean(h_f32 * h_f32, axis=0, keepdims=True) - mean * mean
    scale = gamma * jax.lax.rsqrt(var + EPS)
    shift = beta - mean * scale
    return scale, shift


def discriminator_kernel(xp_ref, w1_ref, w2_ref, p32_ref, p64_ref, o_ref):
    # xp_ref : (B*L, 9)  bf16  im2col patches of the input (K*Cin = 9)
    # w1_ref : (9, 32)   bf16  conv1 weight, stacked (K*Cin, Cout)
    # w2_ref : (96, 64)  bf16  conv2 weight, stacked (K*Cin, Cout)
    # p32_ref: (2, 32)   f32   [gamma1; beta1]
    # p64_ref: (3, 64)   f32   [gamma2; beta2; linear weight row]
    # o_ref  : (B, 1)    f32   sigmoid output
    B = o_ref.shape[0]
    R = xp_ref.shape[0]
    L = R // B
    C1 = w1_ref.shape[1]

    # ---- conv1 as ONE matmul (contraction 9), bf16 operands, f32 accum -----
    h1 = jnp.dot(xp_ref[...], w1_ref[...], preferred_element_type=jnp.float32)
    s1, t1 = _bn_scale_shift(h1, p32_ref[0:1, :], p32_ref[1:2, :])
    h1 = _leaky_relu(h1 * s1 + t1)                                # (R, 32) f32

    # ---- build the three conv2 taps (per-sequence "same" padding) ----------
    # rows are (b, l) row-major; shift rows by +/-1 and mask the l==0 / l==L-1
    # boundaries so taps never cross a batch element.
    l_idx = jax.lax.broadcasted_iota(jnp.int32, (R, 1), 0) % L
    zrow = jnp.zeros((1, C1), jnp.float32)
    prev = jnp.concatenate([zrow, h1[: R - 1, :]], axis=0)        # h1[l-1]
    prev = prev * (l_idx != 0).astype(jnp.float32)
    nxt = jnp.concatenate([h1[1:, :], zrow], axis=0)              # h1[l+1]
    nxt = nxt * (l_idx != L - 1).astype(jnp.float32)
    patches = jnp.concatenate([prev, h1, nxt], axis=-1)           # (R, 96)

    # ---- conv2 as ONE matmul (contraction 96), bf16 operands, f32 accum ----
    h2 = jnp.dot(patches.astype(jnp.bfloat16), w2_ref[...],
                 preferred_element_type=jnp.float32)              # (R, 64) f32
    s2, t2 = _bn_scale_shift(h2, p64_ref[0:1, :], p64_ref[1:2, :])

    # ---- only the last time step feeds the head (stats used every row) -----
    last = h2.reshape(B, L, -1)[:, L - 1, :]                      # (B, 64)
    last = _leaky_relu(last * s2 + t2)

    # ---- Linear(64->1, bias=False) as VPU mul + lane reduce, then sigmoid --
    logits = jnp.sum(last * p64_ref[2:3, :], axis=-1, keepdims=True)  # (B, 1)
    o_ref[...] = jax.nn.sigmoid(logits).astype(o_ref.dtype)


def _im2col_1d(x):
    # x: (B, L, Cin) -> (B*L, 3*Cin) patches for a K=3, padding=1 "same" conv.
    B, L, Cin = x.shape
    xp = jnp.pad(x, ((0, 0), (1, 1), (0, 0)))
    cols = jnp.concatenate(
        [xp[:, 0:L, :], xp[:, 1:L + 1, :], xp[:, 2:L + 2, :]], axis=-1)
    return cols.reshape(B * L, 3 * Cin)


@jax.jit
def discriminator_forward(x, params):
    """x: (B, L, 3) f32 (same calling convention as the PyTorch module).
    params use native PyTorch layouts:
      w1 (32,3,3), b1 (32,), g1 (32,), be1 (32,),
      w2 (64,32,3), b2 (64,), g2 (64,), be2 (64,), w3 (1,64).
    """
    w1, b1, g1, be1, w2, b2, g2, be2, w3 = params
    # Conv biases cancel exactly under train-mode BatchNorm (mean(x+b)=mean(x)+b),
    # so they are not passed to the kernel.  (Reinstate if eval-mode running
    # stats are ever used.)
    del b1, b2
    B, L, _ = x.shape

    # Wrapper-side layout prep (tiny, handled by XLA outside the kernel):
    xp = _im2col_1d(x).astype(jnp.bfloat16)                           # (B*L, 9)
    # (Cout, Cin, K) -> (K, Cin, Cout) -> (K*Cin, Cout), matching patch order.
    w1s = jnp.transpose(w1, (2, 1, 0)).reshape(-1, w1.shape[0]).astype(jnp.bfloat16)
    w2s = jnp.transpose(w2, (2, 1, 0)).reshape(-1, w2.shape[0]).astype(jnp.bfloat16)
    p32 = jnp.stack([g1, be1]).astype(jnp.float32)                    # (2, 32)
    p64 = jnp.stack([g2, be2, w3[0]]).astype(jnp.float32)             # (3, 64)

    vmem = pl.BlockSpec(memory_space=pltpu.MemorySpace.VMEM)
    return pl.pallas_call(
        discriminator_kernel,
        out_shape=jax.ShapeDtypeStruct((B, 1), jnp.float32),
        in_specs=[vmem] * 5,
        out_specs=vmem,
    )(xp, w1s, w2s, p32, p64)


def discriminator_ref(x, params):
    # Pure-JAX f32 reference of the PyTorch module (keeps the conv biases and
    # two-pass variance) - independent check of the kernel's optimizations.
    w1, b1, g1, be1, w2, b2, g2, be2, w3 = params
    B, L, _ = x.shape

    def conv1d_same(h, w, b):          # h: (B, L, Cin), w: (Cout, Cin, K)
        Cout, Cin, K = w.shape
        hp = jnp.pad(h, ((0, 0), (1, 1), (0, 0)))
        out = jnp.zeros((B, L, Cout), jnp.float32)
        for k in range(K):
            out = out + jnp.einsum("blc,oc->blo", hp[:, k:k + L, :], w[:, :, k])
        return out + b

    def bn_train(h2d, gamma, beta):
        mean = jnp.mean(h2d, axis=0, keepdims=True)
        var = jnp.mean((h2d - mean) ** 2, axis=0, keepdims=True)
        return (h2d - mean) * jax.lax.rsqrt(var + EPS) * gamma + beta

    h = conv1d_same(x, w1, b1).reshape(B * L, -1)
    h = _leaky_relu(bn_train(h, g1, be1)).reshape(B, L, -1)
    h = conv1d_same(h, w2, b2).reshape(B * L, -1)
    h = _leaky_relu(bn_train(h, g2, be2)).reshape(B, L, -1)
    logits = h[:, L - 1, :] @ w3.T
    return jax.nn.sigmoid(logits)


if __name__ == "__main__":
    key = jax.random.PRNGKey(0)
    ks = jax.random.split(key, 10)
    B, L, CIN = 2, 8, 3

    x = jax.random.normal(ks[0], (B, L, CIN), jnp.float32)

    # PyTorch-layout parameters of a freshly-constructed (train-mode) module.
    w1 = 0.2 * jax.random.normal(ks[1], (32, CIN, 3), jnp.float32)   # Conv1d(3,32,3)
    b1 = 0.1 * jax.random.normal(ks[2], (32,), jnp.float32)
    g1 = 1.0 + 0.1 * jax.random.normal(ks[3], (32,), jnp.float32)
    be1 = 0.1 * jax.random.normal(ks[4], (32,), jnp.float32)

    w2 = 0.1 * jax.random.normal(ks[5], (64, 32, 3), jnp.float32)    # Conv1d(32,64,3)
    b2 = 0.1 * jax.random.normal(ks[6], (64,), jnp.float32)
    g2 = 1.0 + 0.1 * jax.random.normal(ks[7], (64,), jnp.float32)
    be2 = 0.1 * jax.random.normal(ks[8], (64,), jnp.float32)

    w3 = 0.2 * jax.random.normal(ks[9], (1, 64), jnp.float32)        # Linear(64,1,bias=False)

    params = (w1, b1, g1, be1, w2, b2, g2, be2, w3)

    out = jax.block_until_ready(discriminator_forward(x, params))

    assert out.shape == (B, 1)
    assert bool(jnp.all(jnp.isfinite(out)))
    ref = discriminator_ref(x, params)
    # bf16 MXU operands (f32 accumulation) vs. the pure-f32 reference.
    assert bool(jnp.allclose(out, ref, rtol=2e-2, atol=2e-2)), (out, ref)
    print("KERNEL_OK")
</pallas_src>

<mosaic_0001>
module attributes {stable_mosaic.version = 11 : i64} {
  func.func @discriminator_kernel(%arg0: memref<16x9xbf16, #tpu.memory_space<vmem>>, %arg1: memref<9x32xbf16, #tpu.memory_space<vmem>>, %arg2: memref<96x64xbf16, #tpu.memory_space<vmem>>, %arg3: memref<2x32xf32, #tpu.memory_space<vmem>>, %arg4: memref<3x64xf32, #tpu.memory_space<vmem>>, %arg5: memref<2x1xf32, #tpu.memory_space<vmem>>) attributes {dimension_semantics = [], scalar_prefetch = 0 : i64, scratch_operands = 0 : i64, tpu.core_type = #tpu.core_type<tc>} {
    %c0 = arith.constant 0 : index
    %c0_0 = arith.constant 0 : index
    %0 = vector.load %arg0[%c0, %c0_0] : memref<16x9xbf16, #tpu.memory_space<vmem>>, vector<16x9xbf16>
    %c0_1 = arith.constant 0 : index
    %c0_2 = arith.constant 0 : index
    %1 = vector.load %arg1[%c0_1, %c0_2] : memref<9x32xbf16, #tpu.memory_space<vmem>>, vector<9x32xbf16>
    %cst = arith.constant dense<0.000000e+00> : vector<16x32xf32>
    %2 = tpu.matmul %0, %1, %cst {dimension_numbers = #tpu.dot_dimension_numbers<[1], [0], [0], [1], [0, 0, 1, 1], [], []>} : vector<16x9xbf16>, vector<9x32xbf16>, vector<16x32xf32> -> vector<16x32xf32>
    %c0_3 = arith.constant 0 : index
    %c0_4 = arith.constant 0 : index
    %3 = vector.load %arg3[%c0_3, %c0_4] : memref<2x32xf32, #tpu.memory_space<vmem>>, vector<1x32xf32>
    %c1 = arith.constant 1 : index
    %c0_5 = arith.constant 0 : index
    %4 = vector.load %arg3[%c1, %c0_5] : memref<2x32xf32, #tpu.memory_space<vmem>>, vector<1x32xf32>
    %cst_6 = arith.constant dense<0.000000e+00> : vector<32xf32>
    %5 = vector.multi_reduction <add>, %2, %cst_6 [0] : vector<16x32xf32> to vector<32xf32>
    %6 = vector.shape_cast %5 : vector<32xf32> to vector<1x32xf32>
    %cst_7 = arith.constant 1.600000e+01 : f32
    %7 = vector.broadcast %cst_7 : f32 to vector<1x32xf32>
    %8 = arith.divf %6, %7 : vector<1x32xf32>
    %9 = arith.mulf %2, %2 : vector<16x32xf32>
    %cst_8 = arith.constant dense<0.000000e+00> : vector<32xf32>
    %10 = vector.multi_reduction <add>, %9, %cst_8 [0] : vector<16x32xf32> to vector<32xf32>
    %11 = vector.shape_cast %10 : vector<32xf32> to vector<1x32xf32>
    %cst_9 = arith.constant 1.600000e+01 : f32
    %12 = vector.broadcast %cst_9 : f32 to vector<1x32xf32>
    %13 = arith.divf %11, %12 : vector<1x32xf32>
    %14 = arith.mulf %8, %8 : vector<1x32xf32>
    %15 = arith.subf %13, %14 : vector<1x32xf32>
    %cst_10 = arith.constant 9.99999974E-6 : f32
    %16 = vector.broadcast %cst_10 : f32 to vector<1x32xf32>
    %17 = arith.addf %15, %16 : vector<1x32xf32>
    %18 = math.rsqrt %17 : vector<1x32xf32>
    %19 = arith.mulf %3, %18 : vector<1x32xf32>
    %20 = arith.mulf %8, %19 : vector<1x32xf32>
    %21 = arith.subf %4, %20 : vector<1x32xf32>
    %22 = vector.broadcast %19 : vector<1x32xf32> to vector<16x32xf32>
    %23 = arith.mulf %2, %22 : vector<16x32xf32>
    %24 = vector.broadcast %21 : vector<1x32xf32> to vector<16x32xf32>
    %25 = arith.addf %23, %24 : vector<16x32xf32>
    %cst_11 = arith.constant 0.000000e+00 : f32
    %26 = vector.broadcast %cst_11 : f32 to vector<16x32xf32>
    %27 = arith.cmpf oge, %25, %26 : vector<16x32xf32>
    %cst_12 = arith.constant 2.000000e-01 : f32
    %28 = vector.broadcast %cst_12 : f32 to vector<16x32xf32>
    %29 = arith.mulf %28, %25 : vector<16x32xf32>
    %30 = arith.select %27, %25, %29 : vector<16x32xi1>, vector<16x32xf32>
    %31 = tpu.iota {dimensions = array<i32: 0>} : vector<16x1xi32>
    %c8_i32 = arith.constant 8 : i32
    %c0_i32 = arith.constant 0 : i32
    %32 = arith.cmpi eq, %c8_i32, %c0_i32 : i32
    %c1_i32 = arith.constant 1 : i32
    %33 = arith.select %32, %c1_i32, %c8_i32 : i32
    %34 = vector.broadcast %33 : i32 to vector<16x1xi32>
    %35 = arith.remsi %31, %34 : vector<16x1xi32>
    %c0_i32_13 = arith.constant 0 : i32
    %36 = vector.broadcast %c0_i32_13 : i32 to vector<16x1xi32>
    %37 = arith.cmpi ne, %35, %36 : vector<16x1xi32>
    %c0_i32_14 = arith.constant 0 : i32
    %38 = vector.broadcast %c0_i32_14 : i32 to vector<16x1xi32>
    %39 = arith.cmpi slt, %35, %38 : vector<16x1xi32>
    %c0_i32_15 = arith.constant 0 : i32
    %40 = arith.cmpi slt, %33, %c0_i32_15 : i32
    %41 = vector.broadcast %40 : i1 to vector<16x1xi1>
    %42 = vector.broadcast %41 : vector<16x1xi1> to vector<16x1xi1>
    %43 = arith.xori %39, %42 : vector<16x1xi1>
    %44 = arith.andi %43, %37 : vector<16x1xi1>
    %45 = vector.broadcast %33 : i32 to vector<16x1xi32>
    %46 = arith.addi %35, %45 : vector<16x1xi32>
    %47 = arith.select %44, %46, %35 : vector<16x1xi1>, vector<16x1xi32>
    %cst_16 = arith.constant 0.000000e+00 : f32
    %48 = vector.broadcast %cst_16 : f32 to vector<1x32xf32>
    %49 = vector.extract_strided_slice %30 {offsets = [0, 0], sizes = [15, 32], strides = [1, 1]} : vector<16x32xf32> to vector<15x32xf32>
    %50 = tpu.concatenate %48, %49 in 0 : vector<1x32xf32>, vector<15x32xf32> -> vector<16x32xf32>
    %c0_i32_17 = arith.constant 0 : i32
    %51 = vector.broadcast %c0_i32_17 : i32 to vector<16x1xi32>
    %52 = arith.cmpi ne, %47, %51 : vector<16x1xi32>
    %53 = arith.extui %52 : vector<16x1xi1> to vector<16x1xi32>
    %54 = arith.sitofp %53 : vector<16x1xi32> to vector<16x1xf32>
    %55 = vector.broadcast %54 : vector<16x1xf32> to vector<16x32xf32>
    %56 = arith.mulf %50, %55 : vector<16x32xf32>
    %57 = vector.extract_strided_slice %30 {offsets = [1, 0], sizes = [15, 32], strides = [1, 1]} : vector<16x32xf32> to vector<15x32xf32>
    %58 = tpu.concatenate %57, %48 in 0 : vector<15x32xf32>, vector<1x32xf32> -> vector<16x32xf32>
    %c7_i32 = arith.constant 7 : i32
    %59 = vector.broadcast %c7_i32 : i32 to vector<16x1xi32>
    %60 = arith.cmpi ne, %47, %59 : vector<16x1xi32>
    %61 = arith.extui %60 : vector<16x1xi1> to vector<16x1xi32>
    %62 = arith.sitofp %61 : vector<16x1xi32> to vector<16x1xf32>
    %63 = vector.broadcast %62 : vector<16x1xf32> to vector<16x32xf32>
    %64 = arith.mulf %58, %63 : vector<16x32xf32>
    %65 = tpu.concatenate %56, %30, %64 in 1 : vector<16x32xf32>, vector<16x32xf32>, vector<16x32xf32> -> vector<16x96xf32>
    %66 = arith.truncf %65 : vector<16x96xf32> to vector<16x96xbf16>
    %c0_18 = arith.constant 0 : index
    %c0_19 = arith.constant 0 : index
    %67 = vector.load %arg2[%c0_18, %c0_19] : memref<96x64xbf16, #tpu.memory_space<vmem>>, vector<96x64xbf16>
    %cst_20 = arith.constant dense<0.000000e+00> : vector<16x64xf32>
    %68 = tpu.matmul %66, %67, %cst_20 {dimension_numbers = #tpu.dot_dimension_numbers<[1], [0], [0], [1], [0, 0, 1, 1], [], []>} : vector<16x96xbf16>, vector<96x64xbf16>, vector<16x64xf32> -> vector<16x64xf32>
    %c0_21 = arith.constant 0 : index
    %c0_22 = arith.constant 0 : index
    %69 = vector.load %arg4[%c0_21, %c0_22] : memref<3x64xf32, #tpu.memory_space<vmem>>, vector<1x64xf32>
    %c1_23 = arith.constant 1 : index
    %c0_24 = arith.constant 0 : index
    %70 = vector.load %arg4[%c1_23, %c0_24] : memref<3x64xf32, #tpu.memory_space<vmem>>, vector<1x64xf32>
    %cst_25 = arith.constant dense<0.000000e+00> : vector<64xf32>
    %71 = vector.multi_reduction <add>, %68, %cst_25 [0] : vector<16x64xf32> to vector<64xf32>
    %72 = vector.shape_cast %71 : vector<64xf32> to vector<1x64xf32>
    %cst_26 = arith.constant 1.600000e+01 : f32
    %73 = vector.broadcast %cst_26 : f32 to vector<1x64xf32>
    %74 = arith.divf %72, %73 : vector<1x64xf32>
    %75 = arith.mulf %68, %68 : vector<16x64xf32>
    %cst_27 = arith.constant dense<0.000000e+00> : vector<64xf32>
    %76 = vector.multi_reduction <add>, %75, %cst_27 [0] : vector<16x64xf32> to vector<64xf32>
    %77 = vector.shape_cast %76 : vector<64xf32> to vector<1x64xf32>
    %cst_28 = arith.constant 1.600000e+01 : f32
    %78 = vector.broadcast %cst_28 : f32 to vector<1x64xf32>
    %79 = arith.divf %77, %78 : vector<1x64xf32>
    %80 = arith.mulf %74, %74 : vector<1x64xf32>
    %81 = arith.subf %79, %80 : vector<1x64xf32>
    %cst_29 = arith.constant 9.99999974E-6 : f32
    %82 = vector.broadcast %cst_29 : f32 to vector<1x64xf32>
    %83 = arith.addf %81, %82 : vector<1x64xf32>
    %84 = math.rsqrt %83 : vector<1x64xf32>
    %85 = arith.mulf %69, %84 : vector<1x64xf32>
    %86 = arith.mulf %74, %85 : vector<1x64xf32>
    %87 = arith.subf %70, %86 : vector<1x64xf32>
    %88 = vector.shape_cast %68 : vector<16x64xf32> to vector<2x8x64xf32>
    %89 = vector.extract_strided_slice %88 {offsets = [0, 7, 0], sizes = [2, 1, 64], strides = [1, 1, 1]} : vector<2x8x64xf32> to vector<2x1x64xf32>
    %90 = vector.shape_cast %89 : vector<2x1x64xf32> to vector<2x64xf32>
    %91 = vector.broadcast %85 : vector<1x64xf32> to vector<2x64xf32>
    %92 = arith.mulf %90, %91 : vector<2x64xf32>
    %93 = vector.broadcast %87 : vector<1x64xf32> to vector<2x64xf32>
    %94 = arith.addf %92, %93 : vector<2x64xf32>
    %cst_30 = arith.constant 0.000000e+00 : f32
    %95 = vector.broadcast %cst_30 : f32 to vector<2x64xf32>
    %96 = arith.cmpf oge, %94, %95 : vector<2x64xf32>
    %cst_31 = arith.constant 2.000000e-01 : f32
    %97 = vector.broadcast %cst_31 : f32 to vector<2x64xf32>
    %98 = arith.mulf %97, %94 : vector<2x64xf32>
    %99 = arith.select %96, %94, %98 : vector<2x64xi1>, vector<2x64xf32>
    %c2 = arith.constant 2 : index
    %c0_32 = arith.constant 0 : index
    %100 = vector.load %arg4[%c2, %c0_32] : memref<3x64xf32, #tpu.memory_space<vmem>>, vector<1x64xf32>
    %101 = vector.broadcast %100 : vector<1x64xf32> to vector<2x64xf32>
    %102 = arith.mulf %99, %101 : vector<2x64xf32>
    %cst_33 = arith.constant dense<0.000000e+00> : vector<2xf32>
    %103 = vector.multi_reduction <add>, %102, %cst_33 [1] : vector<2x64xf32> to vector<2xf32>
    %104 = vector.shape_cast %103 : vector<2xf32> to vector<2x1xf32>
    %105 = arith.negf %104 : vector<2x1xf32>
    %106 = math.exp %105 : vector<2x1xf32>
    %cst_34 = arith.constant 1.000000e+00 : f32
    %107 = vector.broadcast %cst_34 : f32 to vector<2x1xf32>
    %108 = arith.addf %107, %106 : vector<2x1xf32>
    %109 = arith.divf %107, %108 : vector<2x1xf32>
    %c0_35 = arith.constant 0 : index
    %c0_36 = arith.constant 0 : index
    %110 = vector.load %arg5[%c0_35, %c0_36] : memref<2x1xf32, #tpu.memory_space<vmem>>, vector<2x1xf32>
    tpu.vector_store %arg5[%c0_35, %c0_36], %109 {strides = array<i32>} : memref<2x1xf32, #tpu.memory_space<vmem>>, vector<2x1xf32>,
    return
  }
}

</mosaic_0001>

<bundles_post_ra>
// kernel: discriminator_forward.1
= control target key start
LH: loop header
LB: loop body
LE: loop exit
PB: predicated region body
PF: predicated region fallthrough
CT: control target
= control target key end

     0   :  { %vm39_vm0 = vcmask 1043456   ;;  %vm40_vm1 = vcmask 1044480   ;;  %v482_v0 = vmov 0.0   ;;  %v483_v2 = vmov 65535   ;;  %s486_s10 = smov 64   ;;  %s597_s1 = inlined_call_operand.vmem [shape: bf16[9,32], index: 1, kind: input, shape index: {}]   ;;  %s598_s0 = inlined_call_operand.vmem [shape: bf16[16,9], index: 0, kind: input, shape index: {}]   ;;  %s599_s2 = inlined_call_operand.vmem [shape: bf16[96,64], index: 2, kind: input, shape index: {}]   ;;  %s600_s3 = inlined_call_operand.vmem [shape: f32[2,32], index: 3, kind: input, shape index: {}]   ;;  %s601_s4 = inlined_call_operand.vmem [shape: f32[3,64], index: 4, kind: input, shape index: {}]   ;;  %s602_s5 = inlined_call_operand.vmem [shape: f32[2,1], index: 5, kind: output, shape index: {}]  }
   0x1   :  { %425 = vmatprep.subr.bf16.mxu0 %v482_v0  ;;  %v462_v1 = vld [vmem:[%s597_s1] sm:$0x1f]   ;;  %431 = vmatprep.subr.bf16.mxu1 %v482_v0  ;;  %v41_v3 = vsel %vm39_vm0, 4294967295, %v483_v2  ;;  %vm484_vm2 = vmmov 0   ;;  %vm35_vm3 = vcmask 72704   ;;  %v465_v8 = vld [vmem:[%s599_s2 + $0x8] sm:$0xff]   ;;  %v120_v40 = vlaneseq }
   0x2   :  { %v42_v4 = vsel %vm40_vm1, %v41_v3, 0  ;;  %427 = vmatprep.mubr.msk.bf16.mxu0 %vm484_vm2, %v482_v0  ;;  %443 = vmatprep.mubr.msk.bf16.mxu1 %vm484_vm2, %v482_v0  ;;  %v463_v6 = vld [vmem:[%s598_s0] sm:$0xff]   ;;  %v466_v9 = vld [vmem:[%s599_s2 + $0x10] sm:$0xff]   ;;  %v467_v10 = vld [vmem:[%s599_s2 + $0x18] sm:$0xff]   ;;  %vm89_vm4 = vcmask 261120   ;;  %vm167_vm10 = vcmask 1040384  }
   0x3   :  { %v44_v5 = vand.u32 %v462_v1, %v42_v4  ;;  %v464_v7 = vld [vmem:[%s599_s2] sm:$0xff]   ;;  %v121_v41 = vshrl.u32 %v120_v40, 7  ;;  %v469_v59 = vld [vmem:[%s599_s2 + $0x28] sm:$0xff]   ;;  %vm182_vm11 = vcmask 1046528   ;;  %vm213_vm13 = vcmask 523264  }
   0x4   :  { %432 = vmatpush3.bf16.msra.mxu1 %v464_v7  ;;  %v87_v42 = vld [vmem:[%s600_s3] sm:$0x1]  ;;  %v88_v46 = vld [vmem:[%s600_s3 + $0x1] sm:$0x1]  ;;  %vm265_vm14 = vcmask 785408   ;;  %vm371_vm1 = vcmask 523271  }
   0x5   :  { %426 = vmatpush3.bf16.msra.mxu0 %v44_v5  ;;  %433 = vmatprep.subr.bf16.mxu1 %v482_v0  ;;  %v550_v43 = vsub.s32 0, %v121_v41  ;;  %v140_v47 = vadd.s32 8, %v121_v41  ;;  %v145_v53 = vand.u32 7, %v121_v41  ;;  %v468_v54 = vld [vmem:[%s599_s2 + $0x20] sm:$0xff]   ;;  %s485_s2 = smov 32   ;;  %vm375_vm2 = vcmask 516096  }
   0x7   :  { %v152_v55 = vand.u32 7, %v140_v47  ;;  %vm174_vm5 = vcmp.ne.s32.totalorder %v145_v53, 0  ;;  %vm189_vm12 = vcmp.ne.s32.totalorder %v145_v53, 7 }
   0x8   :  { %428 = vmatmul.mubr.msk.bf16.vlgmr.msra.gmra.mrb[0].mxu0 %vm35_vm3, %v463_v6  ;;  %434 = vmatpush3.bf16.msra.mxu1 %v465_v8  ;;  %v402_v62 = vsel %vm174_vm5, 1.0, %v482_v0  ;;  %vm391_vm3 = vcmask 7175  }
   0x9   :  { %435 = vmatprep.subr.bf16.mxu1 %v482_v0  ;;  %vm175_vm6 = vcmp.ne.s32.totalorder %v152_v55, 0  ;;  %vm190_vm7 = vcmp.ne.s32.totalorder %v152_v55, 7 }
   0xa   :  { %v405_v2 = vsel %vm190_vm7, 1.0, %v482_v0  ;;  %v403_v3 = vsel %vm175_vm6, 1.0, %v482_v0 }
   0xc   :  { %436 = vmatpush3.bf16.msra.mxu1 %v466_v9  ;;  %v404_v9 = vsel %vm189_vm12, 1.0, %v482_v0 }
   0xd   :  { %437 = vmatprep.subr.bf16.mxu1 %v482_v0 }
  0x10   :  { %438 = vmatpush3.bf16.msra.mxu1 %v467_v10 }
  0x11   :  { %439 = vmatprep.subr.bf16.mxu1 %v482_v0 }
  0x14   :  { %440 = vmatpush3.bf16.msra.mxu1 %v468_v54 }
  0x15   :  { %441 = vmatprep.subr.bf16.mxu1 %v482_v0 }
  0x18   :  { %442 = vmatpush3.bf16.msra.mxu1 %v469_v59  ;;  %v310_v59 = vld [vmem:[%s601_s4] sm:$0x1] }
  0xdb   :  { %v80_v11 = vpop.f32.mrb[0].mxu0 }
  0xdc   :  { %v101_v12 = vmul.f32 %v80_v11, %v80_v11  ;;  %v429_v13 = vpop.f32.mrb[1].mxu0  ;;  %v90_v15 = vsel %vm89_vm4, %v80_v11, 0.0 }
  0xdd   :  { %v83_v14 = vpop.f32.mrb[2].mxu0 }
  0xde   :  { %v91_v16 = vsel %vm89_vm4, %v83_v14, 0.0  ;;  %v102_v17 = vmul.f32 %v83_v14, %v83_v14  ;;  %v430_v18 = vpop.f32.mrb[3].mxu0  ;;  %v103_v20 = vsel %vm89_vm4, %v101_v12, 0.0 }
  0xdf   :  { %v92_v19 = vadd.f32 %v91_v16, %v90_v15 }
  0xe0   :  { %v104_v21 = vsel %vm89_vm4, %v102_v17, 0.0 }
  0xe1   :  { %v93_v22 = vrot.slane %v92_v19, 4  ;;  %v105_v23 = vadd.f32 %v104_v21, %v103_v20 }
  0xe3   :  { %v94_v24 = vadd.f32 %v93_v22, %v92_v19  ;;  %v106_v25 = vrot.slane %v105_v23, 4 }
  0xe5   :  { %v95_v26 = vrot.slane %v94_v24, 2  ;;  %v107_v27 = vadd.f32 %v106_v25, %v105_v23 }
  0xe7   :  { %v96_v28 = vadd.f32 %v95_v26, %v94_v24  ;;  %v108_v29 = vrot.slane %v107_v27, 2 }
  0xe9   :  { %v97_v30 = vrot.slane %v96_v28, 1  ;;  %v109_v31 = vadd.f32 %v108_v29, %v107_v27 }
  0xeb   :  { %v98_v32 = vadd.f32 %v97_v30, %v96_v28  ;;  %v110_v33 = vrot.slane %v109_v31, 1 }
  0xed   :  { %v100_v34 = vmul.f32 0.0625, %v98_v32  ;;  %v111_v35 = vadd.f32 %v110_v33, %v109_v31 }
  0xef   :  { %v112_v36 = vmul.f32 0.0625, %v111_v35  ;;  %v113_v37 = vmul.f32 %v100_v34, %v100_v34 }
  0xf1   :  { %v114_v38 = vsub.f32 %v112_v36, %v113_v37 }
  0xf3   :  { %v115_v39 = vadd.f32 1e-05, %v114_v38 }
  0xf5   :  { %470 = vrsqrt.f32 %v115_v39 }
  0xff   :  { %v471_v44 = vpop.eup %470 }
 0x100   :  { %v117_v45 = vmul.f32 %v471_v44, %v87_v42 }
 0x102   :  { %v118_v48 = vmul.f32 %v117_v45, %v100_v34  ;;  %v123_v49 = vrot.slane %v117_v45, %v550_v43 }
 0x104   :  { %v119_v50 = vsub.f32 %v88_v46, %v118_v48  ;;  %v124_v51 = vmul.f32 %v123_v49, %v80_v11  ;;  %v125_v52 = vmul.f32 %v123_v49, %v83_v14 }
 0x106   :  { %v129_v56 = vrot.slane %v119_v50, %v550_v43 }
 0x108   :  { %v131_v57 = vadd.f32 %v129_v56, %v125_v52  ;;  %v130_v58 = vadd.f32 %v129_v56, %v124_v51 }
 0x10a   :  { %vm132_vm8 = vcmp.ge.f32.partialorder %v130_v58, 0.0  ;;  %vm133_vm9 = vcmp.ge.f32.partialorder %v131_v57, 0.0  ;;  %v134_v60 = vmul.f32 0.2, %v130_v58  ;;  %v135_v61 = vmul.f32 0.2, %v131_v57 }
 0x10c   :  { %v136_v63 = vsel %vm132_vm8, %v130_v58, %v134_v60  ;;  %v137_v1 = vsel %vm133_vm9, %v131_v57, %v135_v61 }
 0x10d   :  { %v169_v4 = vrot.slane %v137_v1, 7  ;;  %v184_v5 = vrot.slane %v137_v1, 1  ;;  %v452_v6 = vpack.i.bf16 %v137_v1, %v136_v63  ;;  %v168_v7 = vrot.slane %v136_v63, 7 }
 0x10e   :  { %v183_v8 = vrot.slane %v136_v63, 1 }
 0x10f   :  { %453 = vrot.lane.b32.xlu0 %v452_v6, %s485_s2  ;;  %v170_v10 = vsel %vm167_vm10, %v168_v7, %v169_v4  ;;  %v173_v11 = vsel %vm167_vm10, 0.0, %v168_v7  ;;  %v188_v12 = vsel %vm182_vm11, %v184_v5, 0.0 }
 0x110   :  { %v180_v13 = vmul.f32 %v402_v62, %v173_v11  ;;  %v185_v14 = vsel %vm182_vm11, %v183_v8, %v184_v5  ;;  %v196_v15 = vmul.f32 %v405_v2, %v188_v12  ;;  %v181_v16 = vmul.f32 %v403_v3, %v170_v10  ;;  %v311_v62 = vld [vmem:[%s601_s4 + $0x1] sm:$0x1]  ;;  %v413_v8 = vld [vmem:[%s601_s4 + $0x2] ss:$0 sm:$0xff] }
 0x111   :  { %v195_v17 = vmul.f32 %v404_v9, %v185_v14 }
 0x113   :  { %v457_v18 = vpack.i.bf16 %v196_v15, %v195_v17 }
 0x115   :  { %458 = vrot.lane.b32.xlu0 %v457_v18, %s486_s10 }
 0x181   :  { %v454_v19 = vpop.permute.xlu0 %453 }
 0x182   :  { %v456_v20 = vunpack.i.h.bf16 %v454_v19  ;;  %v455_v0 = vunpack.i.l.bf16 %v454_v19 }
 0x184   :  { %v211_v24 = vsel %vm89_vm4, %v180_v13, %v455_v0  ;;  %v212_v25 = vsel %vm89_vm4, %v181_v16, %v456_v20  ;;  %vm393_vm4 = vcmask 0  }
 0x187   :  { %v459_v21 = vpop.permute.xlu0 %458 }
 0x188   :  { %v461_v22 = vunpack.i.h.bf16 %v459_v21  ;;  %v460_v23 = vunpack.i.l.bf16 %v459_v21 }
 0x18a   :  { %v214_v26 = vsel %vm213_vm13, %v211_v24, %v460_v23  ;;  %v215_v27 = vsel %vm213_vm13, %v212_v25, %v461_v22 }
 0x18b   :  { %v216_v28 = vpack.c.bf16 %v215_v27, %v214_v26 }
 0x18d   :  { %444 = vmatmul.mubr.msk.bf16.vlgmr.msra.gmra.mrb[0].mxu1 %vm265_vm14, %v216_v28 }
 0x260   :  { %v303_v29 = vpop.f32.mrb[0].mxu1 }
 0x261   :  { %v322_v30 = vmul.f32 %v303_v29, %v303_v29  ;;  %v445_v31 = vpop.f32.mrb[1].mxu1  ;;  %v312_v33 = vsel %vm213_vm13, %v303_v29, 0.0 }
 0x262   :  { %v306_v32 = vpop.f32.mrb[2].mxu1 }
 0x263   :  { %v313_v34 = vsel %vm213_vm13, %v306_v32, 0.0  ;;  %v323_v35 = vmul.f32 %v306_v32, %v306_v32  ;;  %v446_v36 = vpop.f32.mrb[3].mxu1  ;;  %v324_v38 = vsel %vm213_vm13, %v322_v30, 0.0 }
 0x264   :  { %v314_v37 = vadd.f32 %v313_v34, %v312_v33 }
 0x265   :  { %v325_v39 = vsel %vm213_vm13, %v323_v35, 0.0 }
 0x266   :  { %v315_v40 = vrot.slane %v314_v37, 4  ;;  %v326_v41 = vadd.f32 %v325_v39, %v324_v38 }
 0x268   :  { %v316_v42 = vadd.f32 %v315_v40, %v314_v37  ;;  %v327_v44 = vrot.slane %v326_v41, 4 }
 0x26a   :  { %v317_v45 = vrot.slane %v316_v42, 2  ;;  %v328_v46 = vadd.f32 %v327_v44, %v326_v41 }
 0x26c   :  { %v318_v47 = vadd.f32 %v317_v45, %v316_v42  ;;  %v329_v48 = vrot.slane %v328_v46, 2 }
 0x26e   :  { %v319_v49 = vrot.slane %v318_v47, 1  ;;  %v330_v50 = vadd.f32 %v329_v48, %v328_v46 }
 0x270   :  { %v320_v51 = vadd.f32 %v319_v49, %v318_v47  ;;  %v331_v52 = vrot.slane %v330_v50, 1 }
 0x272   :  { %v321_v53 = vmul.f32 0.0625, %v320_v51  ;;  %v332_v54 = vadd.f32 %v331_v52, %v330_v50 }
 0x274   :  { %v333_v55 = vmul.f32 0.0625, %v332_v54  ;;  %v334_v56 = vmul.f32 %v321_v53, %v321_v53 }
 0x276   :  { %v335_v57 = vsub.f32 %v333_v55, %v334_v56 }
 0x278   :  { %v336_v58 = vadd.f32 1e-05, %v335_v57 }
 0x27a   :  { %472 = vrsqrt.f32 %v336_v58 }
 0x284   :  { %v473_v60 = vpop.eup %472 }
 0x285   :  { %v338_v61 = vmul.f32 %v473_v60, %v310_v59 }
 0x287   :  { %v339_v63 = vmul.f32 %v338_v61, %v321_v53  ;;  %v344_v1 = vrot.slane %v338_v61, %v550_v43 }
 0x289   :  { %v340_v2 = vsub.f32 %v311_v62, %v339_v63  ;;  %v345_v3 = vmul.f32 %v344_v1, %v303_v29  ;;  %v346_v4 = vmul.f32 %v344_v1, %v306_v32 }
 0x28b   :  { %v350_v5 = vrot.slane %v340_v2, %v550_v43 }
 0x28d   :  { %v352_v6 = vadd.f32 %v350_v5, %v346_v4  ;;  %v351_v7 = vadd.f32 %v350_v5, %v345_v3 }
 0x28f   :  { %vm353_vm15 = vcmp.ge.f32.partialorder %v351_v7, 0.0  ;;  %v355_v9 = vmul.f32 0.2, %v351_v7  ;;  %vm354_vm0 = vcmp.ge.f32.partialorder %v352_v6, 0.0  ;;  %v356_v10 = vmul.f32 0.2, %v352_v6 }
 0x291   :  { %v357_v11 = vsel %vm353_vm15, %v351_v7, %v355_v9  ;;  %v358_v12 = vsel %vm354_vm0, %v352_v6, %v356_v10 }
 0x292   :  { %v364_v13 = vmul.f32 %v413_v8, %v357_v11  ;;  %v365_v14 = vmul.f32 %v413_v8, %v358_v12 }
 0x294   :  { %v372_v15 = vsel %vm371_vm1, %v364_v13, 0.0  ;;  %v368_v16 = vrot.slane %v365_v14, 7 }
 0x295   :  { %373 = vadd.xlane.f32.xlu1 %v372_v15 }
 0x296   :  { %v376_v43 = vsel %vm375_vm2, %v368_v16, 0.0 }
 0x299   :  { %377 = vadd.xlane.f32.xlu1 %v376_v43 }
 0x322   :  { %v374_v17 = vpop.xlane.xlu1 %373 }
 0x323   :  { %v414_v18 = vmul.f32 -1.442695, %v374_v17 }
 0x325   :  { %474 = vpow2.f32 %v414_v18 }
 0x326   :  { %v378_v19 = vpop.xlane.xlu1 %377 }
 0x327   :  { %v415_v20 = vmul.f32 -1.442695, %v378_v19 }
 0x329   :  { %476 = vpow2.f32 %v415_v20 }
 0x32f   :  { %v475_v0 = vpop.eup %474 }
 0x330   :  { %v385_v21 = vadd.f32 1.0, %v475_v0 }
 0x332   :  { %478 = vrcp.f32 %v385_v21 }
 0x333   :  { %v477_v22 = vpop.eup %476 }
 0x334   :  { %v386_v23 = vadd.f32 1.0, %v477_v22 }
 0x336   :  { %480 = vrcp.f32 %v386_v23 }
 0x33c   :  { %v479_v24 = vpop.eup %478 }
 0x33d   :  { %392 = vst.msk [vmem:[%s602_s5 - $0x7] sm:$0x80] %vm391_vm3, %v479_v24 }
 0x340   :  { %v481_v25 = vpop.eup %480 }
 0x341   :  { %394 = vst.msk [vmem:[%s602_s5 + $0x1] sm:$0x1] %vm393_vm4, %v481_v25 }

</bundles_post_ra>
